<compile_context>
chip_gen: v7x
topology: tpu7x:2x2x1
jax: 0.10.0
libtpu: 0.0.40
codegen_flags: <defaults>
</compile_context>

<pallas_src>
import math
import numpy as np
import jax
import jax.numpy as jnp
from jax.experimental import pallas as pl
from jax.experimental.pallas import tpu as pltpu


_TARGET_LANES = 512                    # preferred packed output row width (>=128)
_MAX_PACK = 32                         # cap on G (bounds f32-HIGHEST matmul cost on v5e)
_OUT_TILE_BYTES = 8 * 1024 * 1024      # per output buffer; x2 double-buffered = 16 MiB
_VMEM_LIMIT_BYTES = 32 * 1024 * 1024   # explicit so v5e (16 MiB default) is covered
_MIN_PALLAS_OUT_ELEMENTS = 1 << 17     # below this, plain jnp beats pallas launch cost


# ---------------------------------------------------------------------------
# Kernels
# ---------------------------------------------------------------------------
def _finish_cos(z, o_ref):
    # cos has no EUP path -> it is a VALU polynomial.  If the caller asked for a
    # bf16 output, run the cosine in bf16 too (packed 2-per-lane on v6e/v7x VPU,
    # ~2x VALU throughput; do NOT request bf16 output on v5e - no bf16 VPU).
    if o_ref.dtype == jnp.bfloat16:
        z = z.astype(jnp.bfloat16)
    o_ref[...] = jnp.cos(z).astype(o_ref.dtype)


def _time_enc_rowtile_kernel(t_ref, w_ref, b_ref, o_ref):
    # t_ref: (TILE_N, 1), w_ref: (1, dim), b_ref: (1, dim), o_ref: (TILE_N, dim)
    # Broadcasted multiply + add on the VPU, cos on the VPU, f32 compute,
    # narrowing (if any) only at the store.
    _finish_cos(t_ref[...] * w_ref[...] + b_ref[...], o_ref)


def _time_enc_packed_kernel(t_ref, wp_ref, b_ref, o_ref):
    # t_ref : (TILE_R, G)      G timestamps packed per output row
    # wp_ref: (G, G*dim) f32   wp[g, g*dim + d] = weight[d]  (zeros elsewhere)
    # b_ref : (1, G*dim) f32   b[0, g*dim + d]  = bias[d]
    # o_ref : (TILE_R, G*dim)  lane-dense; row-major identical to (TILE_R*G, dim)
    #
    # The jnp.dot is a K=G lane-packing device: it applies the weights AND lands
    # the result in a >=128-lane-multiple row (unmasked vst stores - the biggest
    # single lever for this store-bound kernel).  The otherwise idle MXU does it
    # for free.  Precision.HIGHEST is REQUIRED: with DEFAULT the f32 timestamps
    # get truncated to bf16 inside the MXU and accuracy vs torch degrades.
    z = jnp.dot(t_ref[...], wp_ref[...],
                preferred_element_type=jnp.float32,
                precision=jax.lax.Precision.HIGHEST)
    _finish_cos(z + b_ref[...], o_ref)


# ---------------------------------------------------------------------------
# Parameter container (derived tensors built once, off the hot path)
# ---------------------------------------------------------------------------
class TimeEncoderParams:
    def __init__(self, weight, bias, out_dtype=jnp.float32):
        weight = jnp.asarray(weight, jnp.float32).reshape(-1)
        bias = jnp.asarray(bias, jnp.float32).reshape(-1)
        dim = int(weight.shape[0])
        self.dim = dim
        self.out_dtype = jnp.dtype(out_dtype)
        self.weight = weight
        self.bias = bias
        self.w_row = weight.reshape(1, dim)
        self.b_row = bias.reshape(1, dim)

        if dim < 128:
            # Packed path: choose G so G*dim is a multiple of 128 (unmasked
            # 128-lane stores), scale toward _TARGET_LANES, cap at _MAX_PACK so
            # the f32-HIGHEST packing matmul stays cheap on v5e's MXU.  (For
            # pathological dim<=2 the lcm already exceeds the cap; accepted.)
            g = math.lcm(dim, 128) // dim
            scale = max(1, min(_TARGET_LANES // (g * dim), max(1, _MAX_PACK // g)))
            g *= scale
            lanes = g * dim
            self.g = g
            self.lanes = lanes
            # wp[j, j*dim + d] = weight[d]; zeros elsewhere.  Built once here.
            self.wp = (jnp.eye(g, dtype=jnp.float32)[:, :, None]
                       * weight[None, None, :]).reshape(g, lanes)
            self.bp = jnp.tile(bias, g).reshape(1, lanes)
        else:
            self.g = 0
            self.lanes = 0
            self.wp = None
            self.bp = None


def init_time_encoder(dim, out_dtype=jnp.float32):
    # Deterministic init exactly as in reset_parameters():
    #   weight = 1 / 10**linspace(0, 9, dim)  ((dim,1) Linear weight, flattened)
    #   bias   = zeros(dim)
    weight = (1.0 / 10.0 ** np.linspace(0, 9, dim, dtype=np.float32)).astype(np.float32)
    bias = np.zeros((dim,), dtype=np.float32)
    return TimeEncoderParams(weight, bias, out_dtype=out_dtype)


# ---------------------------------------------------------------------------
# pallas_call wrappers
# ---------------------------------------------------------------------------
def _rowtile_call(t_flat, p, n):
    dim = p.dim
    itemsize = p.out_dtype.itemsize
    t2 = t_flat.reshape(n, 1)

    # Fill the per-buffer byte budget (no hard row cap).
    tile_n = max(8, (_OUT_TILE_BYTES // (dim * itemsize)) // 8 * 8)
    if n <= tile_n:
        tile_n = n                       # single full block (always legal)
    grid = (pl.cdiv(n, tile_n),)

    cost = pl.CostEstimate(flops=2 * n * dim,
                           transcendentals=n * dim,
                           bytes_accessed=4 * n + 8 * dim + n * dim * itemsize)

    return pl.pallas_call(
        _time_enc_rowtile_kernel,
        out_shape=jax.ShapeDtypeStruct((n, dim), p.out_dtype),
        grid=grid,
        in_specs=[
            pl.BlockSpec((tile_n, 1), lambda i: (i, 0)),
            pl.BlockSpec((1, dim), lambda i: (0, 0)),    # resident across steps
            pl.BlockSpec((1, dim), lambda i: (0, 0)),    # resident across steps
        ],
        out_specs=pl.BlockSpec((tile_n, dim), lambda i: (i, 0)),
        compiler_params=pltpu.CompilerParams(
            dimension_semantics=("parallel",),
            vmem_limit_bytes=_VMEM_LIMIT_BYTES),
        cost_estimate=cost,
    )(t2, p.w_row, p.b_row)


def _packed_call(t_flat, p, n):
    g, lanes, dim = p.g, p.lanes, p.dim
    itemsize = p.out_dtype.itemsize

    rows = pl.cdiv(n, g)
    pad_n = rows * g
    if pad_n != n:
        # Minimal pad to a multiple of G only (Pallas masks the ragged grid
        # tail).  Padded rows compute cos(bias) and are sliced off below; that
        # slice is an extra HBM pass, so hot paths should keep N % G == 0 or
        # consume the padded array directly.
        t_flat = jnp.pad(t_flat, (0, pad_n - n))
    t2 = t_flat.reshape(rows, g)

    # Fill the per-buffer byte budget (no hard row cap).
    tile_r = max(8, (_OUT_TILE_BYTES // (lanes * itemsize)) // 8 * 8)
    if rows <= tile_r:
        tile_r = rows                    # single full block (always legal)
    grid = (pl.cdiv(rows, tile_r),)

    cost = pl.CostEstimate(
        flops=2 * pad_n * dim * g + pad_n * dim,          # packing matmul + bias add
        transcendentals=pad_n * dim,
        bytes_accessed=4 * pad_n + (g + 1) * lanes * 4 + rows * lanes * itemsize)

    out = pl.pallas_call(
        _time_enc_packed_kernel,
        out_shape=jax.ShapeDtypeStruct((rows, lanes), p.out_dtype),
        grid=grid,
        in_specs=[
            pl.BlockSpec((tile_r, g), lambda i: (i, 0)),
            pl.BlockSpec((g, lanes), lambda i: (0, 0)),   # resident across steps
            pl.BlockSpec((1, lanes), lambda i: (0, 0)),   # resident across steps
        ],
        out_specs=pl.BlockSpec((tile_r, lanes), lambda i: (i, 0)),
        compiler_params=pltpu.CompilerParams(
            dimension_semantics=("parallel",),
            vmem_limit_bytes=_VMEM_LIMIT_BYTES),
        cost_estimate=cost,
    )(t2, p.wp, p.bp)

    out = out.reshape(pad_n, dim)        # free: (rows, G*dim) row-major == (pad_n, dim)
    if pad_n != n:
        out = out[:n]                    # only when N % G != 0 (extra HBM pass)
    return out


def learnable_time_encoder(t, params, *, min_pallas_elements=_MIN_PALLAS_OUT_ELEMENTS):
    """Forward of LearnableTimeEncoder: cos(t.reshape(-1,1) @ weight.T + bias).

    t: arbitrary-shaped float array of timestamps.
    params: TimeEncoderParams (holds weight/bias and precomputed packing tensors).
    Returns (prod(t.shape), dim) array of params.out_dtype (default f32 == torch).
    min_pallas_elements: below this many output elements use plain jnp
    (pallas_call launch + grid overhead dominates tiny inputs).
    """
    t_flat = jnp.asarray(t, jnp.float32).reshape(-1)
    n = t_flat.shape[0]

    if n * params.dim < min_pallas_elements:
        return jnp.cos(t_flat[:, None] * params.weight[None, :]
                       + params.bias[None, :]).astype(params.out_dtype)

    if params.g:                          # dim < 128 -> lane-dense packed path
        return _packed_call(t_flat, params, n)
    return _rowtile_call(t_flat, params, n)


if __name__ == "__main__":
    key = jax.random.PRNGKey(0)
    batch, seq = 2, 8
    t = jax.random.uniform(key, (batch, seq), dtype=jnp.float32) * 100.0

    # dim = 32 -> packed path, G=16, 512-lane rows, n % G == 0 (no pad, no slice).
    p32 = init_time_encoder(32)
    out = jax.block_until_ready(learnable_time_encoder(t, p32, min_pallas_elements=0))
    ref = jnp.cos(t.reshape(-1, 1) * p32.weight[None, :] + p32.bias[None, :])
    assert out.shape == (batch * seq, 32)
    np.testing.assert_allclose(np.asarray(out), np.asarray(ref), rtol=1e-4, atol=1e-4)

    # dim = 128 -> plain row-tiled path (dim >= 128).
    p128 = init_time_encoder(128)
    out2 = jax.block_until_ready(learnable_time_encoder(t, p128, min_pallas_elements=0))
    ref2 = jnp.cos(t.reshape(-1, 1) * p128.weight[None, :] + p128.bias[None, :])
    assert out2.shape == (batch * seq, 128)
    np.testing.assert_allclose(np.asarray(out2), np.asarray(ref2), rtol=1e-4, atol=1e-4)

    # dim = 48 (not a divisor of 128) with ragged n -> lcm-based packed path
    # (G=8, 384-lane rows) plus the minimal pad + tail slice.
    t3 = jax.random.uniform(jax.random.PRNGKey(1), (5, 4), dtype=jnp.float32) * 100.0
    p48 = init_time_encoder(48)
    out3 = jax.block_until_ready(learnable_time_encoder(t3, p48, min_pallas_elements=0))
    ref3 = jnp.cos(t3.reshape(-1, 1) * p48.weight[None, :] + p48.bias[None, :])
    assert out3.shape == (20, 48)
    np.testing.assert_allclose(np.asarray(out3), np.asarray(ref3), rtol=1e-4, atol=1e-4)

    print("KERNEL_OK")
</pallas_src>

<mosaic_0001>
module attributes {stable_mosaic.version = 11 : i64} {
  func.func @_time_enc_packed_kernel(%arg0: i32, %arg1: memref<1x16xf32, #tpu.memory_space<vmem>>, %arg2: memref<16x512xf32, #tpu.memory_space<vmem>>, %arg3: memref<1x512xf32, #tpu.memory_space<vmem>>, %arg4: memref<1x512xf32, #tpu.memory_space<vmem>>) attributes {dimension_semantics = [#tpu.dimension_semantics<parallel>], iteration_bounds = array<i64: 1>, scalar_prefetch = 0 : i64, scratch_operands = 0 : i64, tpu.core_type = #tpu.core_type<tc>, window_params = [{transform_indices = @transform_0, window_bounds = array<i64: 1, 16>}, {pipeline_mode = #tpu.pipeline_mode<synchronous>, transform_indices = @transform_1, window_bounds = array<i64: 16, 512>}, {pipeline_mode = #tpu.pipeline_mode<synchronous>, transform_indices = @transform_2, window_bounds = array<i64: 1, 512>}, {transform_indices = @transform_3, window_bounds = array<i64: 1, 512>}]} {
    %c0 = arith.constant 0 : index
    %c0_0 = arith.constant 0 : index
    %0 = vector.load %arg1[%c0, %c0_0] : memref<1x16xf32, #tpu.memory_space<vmem>>, vector<1x16xf32>
    %c0_1 = arith.constant 0 : index
    %c0_2 = arith.constant 0 : index
    %1 = vector.load %arg2[%c0_1, %c0_2] : memref<16x512xf32, #tpu.memory_space<vmem>>, vector<16x512xf32>
    %cst = arith.constant dense<0.000000e+00> : vector<1x512xf32>
    %2 = tpu.matmul %0, %1, %cst {dimension_numbers = #tpu.dot_dimension_numbers<[1], [0], [0], [1], [0, 0, 1, 1], [], []>, precision = #tpu.contract_precision<fp32>} : vector<1x16xf32>, vector<16x512xf32>, vector<1x512xf32> -> vector<1x512xf32>
    %c0_3 = arith.constant 0 : index
    %c0_4 = arith.constant 0 : index
    %3 = vector.load %arg3[%c0_3, %c0_4] : memref<1x512xf32, #tpu.memory_space<vmem>>, vector<1x512xf32>
    %4 = arith.addf %2, %3 : vector<1x512xf32>
    %5 = math.cos %4 : vector<1x512xf32>
    %c0_5 = arith.constant 0 : index
    %c0_6 = arith.constant 0 : index
    %6 = vector.load %arg4[%c0_5, %c0_6] : memref<1x512xf32, #tpu.memory_space<vmem>>, vector<1x512xf32>
    tpu.vector_store %arg4[%c0_5, %c0_6], %5 {strides = array<i32>} : memref<1x512xf32, #tpu.memory_space<vmem>>, vector<1x512xf32>,
    return
  }
  func.func @transform_0(%arg0: i32) -> (i32, i32) {
    %c0_i32 = arith.constant 0 : i32
    %c0_i32_0 = arith.constant 0 : i32
    return %arg0, %c0_i32 : i32, i32
  }
  func.func @transform_1(%arg0: i32) -> (i32, i32) {
    %c0_i32 = arith.constant 0 : i32
    %c0_i32_0 = arith.constant 0 : i32
    %c0_i32_1 = arith.constant 0 : i32
    return %c0_i32, %c0_i32_0 : i32, i32
  }
  func.func @transform_2(%arg0: i32) -> (i32, i32) {
    %c0_i32 = arith.constant 0 : i32
    %c0_i32_0 = arith.constant 0 : i32
    %c0_i32_1 = arith.constant 0 : i32
    return %c0_i32, %c0_i32_0 : i32, i32
  }
  func.func @transform_3(%arg0: i32) -> (i32, i32) {
    %c0_i32 = arith.constant 0 : i32
    %c0_i32_0 = arith.constant 0 : i32
    return %arg0, %c0_i32 : i32, i32
  }
}

</mosaic_0001>

<bundles_post_ra>
// kernel: tpu_custom_call.1
= control target key start
LH: loop header
LB: loop body
LE: loop exit
PB: predicated region body
PF: predicated region fallthrough
CT: control target
= control target key end

     0   :  { %8 = vsyncpa [#allocation3], 0  ;;  %s2179_s0 = inlined_call_operand.hbm [shape: f32[1,16], index: 0, kind: input, shape index: {}]   ;;  %s2180_s1 = inlined_call_operand.hbm [shape: f32[16,512], index: 1, kind: input, shape index: {}]   ;;  %s2181_s2 = inlined_call_operand.vmem [shape: f32[1,512], index: 2, kind: input, shape index: {}]   ;;  %s2182_s3 = inlined_call_operand.hbm [shape: f32[1,512], index: 3, kind: output, shape index: {}]  }
   0x1   :  { %9 = vsyncpa [#allocation6], 0 }
   0x2   :  { %10 = vsyncpa [#allocation4], 0  ;;  %s1725_s12 = smov [#allocation2]   ;;  %s1726_s14 = smov [#allocation5]  }
   0x3   :  { %s17_s13 = sshll.u32 %s1725_s12, 4  ;;  %s26_s15 = sshll.u32 %s1726_s14, 4  ;;  %s18_s13 = int_to_ptr.vmem [resolvable:$true] %s17_s13  ;;  %s1758_s15 = int_to_ptr.vmem [resolvable:$true] %s26_s15 }
   0x4   :  { %s1653_s18 = scalar_lea.hbm %s2179_s0, 16 }
   0x5   :  { %p1654_p0 = scmp.ne.s32.totalorder %s2179_s0, %s1653_s18  ;;  %p1657_p1 = scmp.lt.u32.totalorder %s1653_s18, %s2179_s0 }
   0x7   :  { %p1659_p2 = pnand %p1657_p1, %p1654_p0 }
   0x9   :  { %1662 = shalt.err (!%p1659_p2)
}
   0xa   :  { %s1663_s23 = scalar_lea.vmem %s18_s13, 16  ;;  %s1667_s24 = scalar_lea.vmem %s18_s13, 32 }
   0xb   :  { %p1664_p3 = scmp.ne.s32.totalorder %s18_s13, %s1663_s23  ;;  %p1668_p4 = scmp.lt.s32.totalorder %s18_s13, %s18_s13 }
   0xc   :  { %p1669_p5 = scmp.lt.s32.totalorder %s1667_s24, %s1663_s23 }
   0xe   :  { %p1670_p6 = por %p1669_p5, %p1668_p4 }
  0x10   :  { %p1671_p7 = pnand %p1670_p6, %p1664_p3 }
  0x12   :  { %1674 = shalt.err (!%p1671_p7)
}
  0x13   :  { %20 = dma.hbm_to_vmem [thread:$0]  %s2179_s0, 16, %s18_s13, [#allocation3]  }
  0x14   :  { %s1675_s29 = scalar_lea.hbm %s2180_s1, 1024 }
  0x15   :  { %p1676_p8 = scmp.ne.s32.totalorder %s2180_s1, %s1675_s29  ;;  %p1679_p9 = scmp.lt.u32.totalorder %s1675_s29, %s2180_s1 }
  0x17   :  { %p1681_p10 = pnand %p1679_p9, %p1676_p8 }
  0x19   :  { %1684 = shalt.err (!%p1681_p10)
}
  0x1a   :  { %s1685_s7 = scalar_lea.vmem %s1758_s15, 1024  ;;  %p1690_p12 = scmp.lt.s32.totalorder %s1758_s15, %s1758_s15 }
  0x1b   :  { %p1686_p11 = scmp.ne.s32.totalorder %s1758_s15, %s1685_s7  ;;  %p1691_p13 = scmp.lt.s32.totalorder %s1685_s7, %s1685_s7 }
  0x1d   :  { %p1692_p0 = por %p1691_p13, %p1690_p12 }
  0x1f   :  { %p1693_p1 = pnand %p1692_p0, %p1686_p11 }
  0x21   :  { %1696 = shalt.err (!%p1693_p1)
}
  0x22   :  { %s1727_s0 = smov 512   ;;  %s1728_s8 = smov 32  }
  0x23   :  { %32 = dma.hbm_to_vmem [thread:$0]  %s2180_s1, 1024, %s1758_s15, [#allocation6], %s1727_s0, %s1727_s0, %s1728_s8  }
  0x24   :  { %1719 = dma.done.wait [#allocation3], 16  }
  0x25   :  { %1720 = vsyncadd [#allocation3], 4294967280 }
  0x26   :  { %1721 = dma.done.wait [#allocation6], 1024  }
  0x27   :  { %1722 = vsyncadd [#allocation6], 4294966272  ;;  %v1729_v0 = vmov 0.0   ;;  %v43_v1 = vld [vmem:[#allocation5 + $0x8] sm:$0xff]  ;;  %v45_v3 = vld [vmem:[#allocation5 + $0x18] sm:$0xff]  ;;  %vm72_vm0 = vcmask 130048  }
  0x28   :  { %144 = vmatprep.mubr.f32.mxu0 %v1729_v0  ;;  %635 = vmatprep.mubr.f32.mxu1 %v1729_v0  ;;  %v47_v2 = vld [vmem:[#allocation5 + $0x28] sm:$0xff]  ;;  %v76_v4 = vand.u32 4294901760, %v43_v1  ;;  %v49_v6 = vld [vmem:[#allocation5 + $0x38] sm:$0xff]  ;;  %v567_v7 = vand.u32 4294901760, %v45_v3  ;;  %v42_v8 = vld [vmem:[#allocation5] sm:$0xff] }
  0x29   :  { %v80_v5 = vand.u32 4294901760, %v47_v2  ;;  %v46_v9 = vld [vmem:[#allocation5 + $0x20] sm:$0xff]  ;;  %v571_v10 = vand.u32 4294901760, %v49_v6  ;;  %v78_v11 = vand.u32 4294901760, %v42_v8  ;;  %v44_v13 = vld [vmem:[#allocation5 + $0x10] sm:$0xff] }
  0x2a   :  { %v82_v12 = vand.u32 4294901760, %v46_v9  ;;  %v48_v14 = vld [vmem:[#allocation5 + $0x30] sm:$0xff]  ;;  %v1793_v16 = vsub.f32 %v43_v1, %v76_v4  ;;  %v1797_v18 = vsub.f32 %v45_v3, %v567_v7  ;;  %v41_v19 = vld [vmem:[#allocation2] sm:$0x1]  ;;  %v569_v25 = vand.u32 4294901760, %v44_v13 }
  0x2b   :  { %v1791_v15 = vpack.c.bf16 %v80_v5, %v76_v4  ;;  %v1795_v17 = vsub.f32 %v47_v2, %v80_v5  ;;  %v1799_v20 = vpack.c.bf16 %v571_v10, %v567_v7  ;;  %v1801_v21 = vsub.f32 %v49_v6, %v571_v10 }
  0x2c   :  { %v1803_v22 = vpack.c.bf16 %v82_v12, %v78_v11  ;;  %v1805_v23 = vsub.f32 %v42_v8, %v78_v11  ;;  %v1808_v24 = vsub.f32 %v46_v9, %v82_v12  ;;  %v573_v26 = vand.u32 4294901760, %v48_v14 }
  0x2d   :  { %1537 = vmatprep.subr.bf16.mxu0 %v1791_v15  ;;  %v74_v27 = vsel %vm72_vm0, %v41_v19, 0  ;;  %1561 = vmatprep.subr.bf16.mxu1 %v1799_v20  ;;  %v158_v29 = vand.u32 4294901760, %v1793_v16  ;;  %v170_v30 = vand.u32 4294901760, %v1795_v17  ;;  %v649_v31 = vand.u32 4294901760, %v1797_v18 }
  0x2e   :  { %1539 = vmatpush1.bf16.msra.mxu0 %v1803_v22  ;;  %v1812_v28 = vand.u32 4294901760, %v74_v27  ;;  %v1817_v32 = vpack.c.bf16 %v573_v26, %v569_v25  ;;  %v1819_v33 = vsub.f32 %v44_v13, %v569_v25  ;;  %v1821_v34 = vsub.f32 %v48_v14, %v573_v26  ;;  %v50_v13 = vld [vmem:[%s2181_s2] sm:$0xf]  ;;  %s1737_s2 = smov [#allocation7]  }
  0x2f   :  { %v661_v35 = vand.u32 4294901760, %v1801_v21  ;;  %v159_v37 = vsub.f32 %v1793_v16, %v158_v29  ;;  %v171_v38 = vsub.f32 %v1795_v17, %v170_v30  ;;  %v650_v39 = vsub.f32 %v1797_v18, %v649_v31  ;;  %s1510_s12 = sshll.u32 %s1737_s2, 4  ;;  %s1511_s12 = int_to_ptr.vmem [resolvable:$true] %s1510_s12 }
  0x30   :  { %v146_v36 = vsub.f32 %v74_v27, %v1812_v28  ;;  %1563 = vmatpush1.bf16.msra.mxu1 %v1817_v32  ;;  %v164_v41 = vand.u32 4294901760, %v1805_v23  ;;  %v176_v42 = vand.u32 4294901760, %v1808_v24  ;;  %v655_v43 = vand.u32 4294901760, %v1819_v33  ;;  %s1697_s13 = scalar_lea.vmem %s1511_s12, 64  ;;  %p1702_p3 = scmp.lt.s32.totalorder %s1511_s12, %s1511_s12 }
  0x31   :  { %v662_v40 = vsub.f32 %v1801_v21, %v661_v35  ;;  %v160_v45 = vand.u32 4294901760, %v159_v37  ;;  %v172_v46 = vand.u32 4294901760, %v171_v38  ;;  %v651_v47 = vand.u32 4294901760, %v650_v39  ;;  %p1698_p2 = scmp.ne.s32.totalorder %s1511_s12, %s1697_s13  ;;  %p1703_p4 = scmp.lt.s32.totalorder %s1697_s13, %s1697_s13 }
  0x32   :  { %v147_v44 = vand.u32 4294901760, %v146_v36  ;;  %v165_v49 = vsub.f32 %v1805_v23, %v164_v41  ;;  %v177_v50 = vsub.f32 %v1808_v24, %v176_v42  ;;  %v656_v51 = vsub.f32 %v1819_v33, %v655_v43 }
  0x33   :  { %v663_v48 = vand.u32 4294901760, %v662_v40  ;;  %v1540_v53 = vpack.c.bf16 %v172_v46, %v160_v45  ;;  %v667_v54 = vand.u32 4294901760, %v1821_v34  ;;  %v1544_v61 = vpack.c.bf16 %v1795_v17, %v1793_v16  ;;  %p1704_p5 = por %p1703_p4, %p1702_p3 }
  0x34   :  { %v148_v52 = vsub.f32 %v146_v36, %v147_v44  ;;  %v166_v56 = vand.u32 4294901760, %v165_v49  ;;  %v178_v57 = vand.u32 4294901760, %v177_v50  ;;  %v657_v59 = vand.u32 4294901760, %v656_v51 }
  0x35   :  { %v1564_v55 = vpack.c.bf16 %v663_v48, %v651_v47  ;;  %1541 = vmatprep.subr.bf16.mxu0 %v1540_v53  ;;  %v668_v60 = vsub.f32 %v1821_v34, %v667_v54  ;;  %v1568_v1 = vpack.c.bf16 %v1801_v21, %v1797_v18  ;;  %v1546_v3 = vpack.c.bf16 %v1808_v24, %v1805_v23  ;;  %p1705_p6 = pnand %p1704_p5, %p1698_p2 }
  0x36   :  { %v149_v58 = vand.u32 4294901760, %v148_v52  ;;  %v1542_v62 = vpack.c.bf16 %v178_v57, %v166_v56  ;;  %v1570_v4 = vpack.c.bf16 %v1821_v34, %v1819_v33  ;;  %v1552_v5 = vpack.c.bf16 %v170_v30, %v158_v29 }
  0x37   :  { %1565 = vmatprep.subr.bf16.mxu1 %v1564_v55  ;;  %v669_v63 = vand.u32 4294901760, %v668_v60  ;;  %v1576_v6 = vpack.c.bf16 %v661_v35, %v649_v31  ;;  %v1554_v7 = vpack.c.bf16 %v176_v42, %v164_v41  ;;  %v1578_v8 = vpack.c.bf16 %v667_v54, %v655_v43 }
  0x38   :  { %150 = vmatmul.mubr.f32.vlgmr.msra.gmra.mrb[0].mxu0 %v149_v58  ;;  %641 = vmatmul.mubr.f32.vlgmr.msra.gmra.mrb[0].mxu1 %v149_v58  ;;  %v52_v9 = vlaneseq  ;;  %v1730_v54 = vmov 683565275   ;;  %v1731_v58 = vmov 2475754826   ;;  %v1732_v60 = vmov 2131351028  }
  0x39   :  { %1543 = vmatpush1.bf16.msra.mxu0 %v1542_v62  ;;  %240 = vmatprep.mubr.f32.mxu0 %v1729_v0  ;;  %v1566_v2 = vpack.c.bf16 %v669_v63, %v657_v59  ;;  %v1733_v62 = vmov 2102212464  }
  0x3a   :  { %731 = vmatprep.mubr.f32.mxu1 %v1729_v0  ;;  %1545 = vmatprep.subr.bf16.mxu0 %v1544_v61  ;;  %v1871_v10 = vshrl.u32 %v52_v9, 7 }
  0x3b   :  { %1567 = vmatpush1.bf16.msra.mxu1 %v1566_v2 }
  0x3c   :  { %1569 = vmatprep.subr.bf16.mxu1 %v1568_v1  ;;  %v54_v11 = vsub.s32 0, %v1871_v10  ;;  %v62_v12 = vsub.s32 2, %v1871_v10  ;;  %v58_v14 = vsub.s32 1, %v1871_v10  ;;  %v66_v30 = vsub.s32 3, %v1871_v10 }
  0x3d   :  { %v1734_v1 = vmov 920167782  }
  0x3e   :  { %v59_v16 = vrot.slane %v50_v13, %v58_v14  ;;  %v67_v39 = vrot.slane %v50_v13, %v66_v30 }
  0x40   :  { %242 = vmatmul.mubr.f32.vlgmr.msra.gmra.mrb[0].mxu0 %v1812_v28  ;;  %733 = vmatmul.mubr.f32.vlgmr.msra.gmra.mrb[0].mxu1 %v1812_v28 }
  0x41   :  { %1547 = vmatpush1.bf16.msra.mxu0 %v1546_v3  ;;  %1571 = vmatpush1.bf16.msra.mxu1 %v1570_v4 }
  0x42   :  { %320 = vmatprep.mubr.f32.mxu0 %v1729_v0  ;;  %811 = vmatprep.mubr.f32.mxu1 %v1729_v0 }
  0x43   :  { %1549 = vmatprep.subr.bf16.mxu0 %v1791_v15  ;;  %1573 = vmatprep.subr.bf16.mxu1 %v1799_v20 }
  0x48   :  { %323 = vmatmul.mubr.f32.vlgmr.msra.gmra.mrb[0].mxu0 %v146_v36  ;;  %814 = vmatmul.mubr.f32.vlgmr.msra.gmra.mrb[0].mxu1 %v146_v36 }
  0x49   :  { %1551 = vmatpush1.bf16.msra.mxu0 %v1803_v22  ;;  %1575 = vmatpush1.bf16.msra.mxu1 %v1817_v32 }
  0x4a   :  { %397 = vmatprep.mubr.f32.mxu0 %v1729_v0  ;;  %888 = vmatprep.mubr.f32.mxu1 %v1729_v0 }
  0x4b   :  { %1553 = vmatprep.subr.bf16.mxu0 %v1552_v5  ;;  %1577 = vmatprep.subr.bf16.mxu1 %v1576_v6 }
  0x50   :  { %401 = vmatmul.mubr.f32.vlgmr.msra.gmra.mrb[0].mxu0 %v147_v44  ;;  %892 = vmatmul.mubr.f32.vlgmr.msra.gmra.mrb[0].mxu1 %v147_v44 }
  0x51   :  { %1555 = vmatpush1.bf16.msra.mxu0 %v1554_v7  ;;  %1579 = vmatpush1.bf16.msra.mxu1 %v1578_v8  ;;  %v1735_v8 = vmov 1326507024  }
  0x52   :  { %483 = vmatprep.mubr.f32.mxu0 %v1729_v0  ;;  %974 = vmatprep.mubr.f32.mxu1 %v1729_v0 }
  0x53   :  { %1557 = vmatprep.subr.bf16.mxu0 %v1791_v15  ;;  %1581 = vmatprep.subr.bf16.mxu1 %v1799_v20  ;;  %v55_v15 = vrot.slane %v50_v13, %v54_v11 }
  0x58   :  { %485 = vmatmul.mubr.f32.vlgmr.msra.gmra.mrb[0].mxu0 %v1812_v28  ;;  %976 = vmatmul.mubr.f32.vlgmr.msra.gmra.mrb[0].mxu1 %v1812_v28 }
  0x59   :  { %1559 = vmatpush1.bf16.msra.mxu0 %v1803_v22  ;;  %1583 = vmatpush1.bf16.msra.mxu1 %v1817_v32 }
  0x5a   :  { %559 = vmatprep.mubr.f32.mxu0 %v1729_v0  ;;  %1050 = vmatprep.mubr.f32.mxu1 %v1729_v0  ;;  %v63_v0 = vrot.slane %v50_v13, %v62_v12 }
  0x60   :  { %561 = vmatmul.mubr.f32.vlgmr.msra.gmra.mrb[0].mxu0 %v1812_v28  ;;  %1052 = vmatmul.mubr.f32.vlgmr.msra.gmra.mrb[0].mxu1 %v1812_v28 }
 0x133   :  { %v562_v17 = vpop.f32.mrb[0].mxu0  ;;  %v1053_v18 = vpop.f32.mrb[0].mxu1 }
 0x134   :  { %v1879_v19 = vadd.f32 %v562_v17, %v55_v15  ;;  %v1881_v20 = vadd.f32 %v1053_v18, %v63_v0  ;;  %v564_v21 = vpop.f32.mrb[1].mxu0  ;;  %v1055_v22 = vpop.f32.mrb[1].mxu1 }
 0x135   :  { %v1883_v23 = vadd.f32 %v564_v21, %v59_v16  ;;  %v1896_v48 = vadd.f32 %v1055_v22, %v67_v39 }
 0x136   :  { %v1058_v24 = vand.u32 2147483647, %v1879_v19  ;;  %v1061_v25 = vand.u32 2139095040, %v1879_v19  ;;  %v1264_v26 = vand.u32 2147483647, %v1881_v20  ;;  %v1267_v27 = vand.u32 2139095040, %v1881_v20 }
 0x137   :  { %v1164_v33 = vand.u32 2139095040, %v1883_v23  ;;  %v1161_v42 = vand.u32 2147483647, %v1883_v23 }
 0x138   :  { %v1062_v28 = vshrl.u32 %v1061_v25, 23  ;;  %v1065_v29 = vand.u32 8388607, %v1058_v24  ;;  %v1268_v31 = vshrl.u32 %v1267_v27, 23  ;;  %v1271_v32 = vand.u32 8388607, %v1264_v26 }
 0x139   :  { %v1165_v36 = vshrl.u32 %v1164_v33, 23  ;;  %v1904_v51 = vand.u32 8388607, %v1161_v42 }
 0x13a   :  { %v1520_v34 = vadd.s32 4294967169, %v1062_v28  ;;  %v1528_v35 = vadd.s32 4294967169, %v1268_v31  ;;  %v1066_v37 = vor.u32 8388608, %v1065_v29  ;;  %v1272_v40 = vor.u32 8388608, %v1271_v32 }
 0x13b   :  { %v1524_v43 = vadd.s32 4294967169, %v1165_v36 }
 0x13c   :  { %v1068_v38 = vadd.s32 1, %v1520_v34  ;;  %v1274_v41 = vadd.s32 1, %v1528_v35  ;;  %v1898_v49 = vshll.u32 %v1066_v37, 8  ;;  %v1900_v50 = vshll.u32 %v1272_v40, 8 }
 0x13d   :  { %v1906_v52 = vadd.s32 1, %v1524_v43 }
 0x13e   :  { %vm1069_vm1 = vcmp.gt.s32.totalorder %v1068_v38, 0  ;;  %vm1275_vm2 = vcmp.gt.s32.totalorder %v1274_v41, 0 }
 0x13f   :  { %v1070_v44 = vsel %vm1069_vm1, %v1068_v38, 0  ;;  %v1276_v47 = vsel %vm1275_vm2, %v1274_v41, 0  ;;  %vm1172_vm7 = vcmp.gt.s32.totalorder %v1906_v52, 0 }
 0x140   :  { %v1071_v45 = vshrl.u32 %v1070_v44, 5  ;;  %v1072_v46 = vand.u32 31, %v1070_v44  ;;  %v1909_v56 = vshrl.u32 %v1276_v47, 5  ;;  %v1278_v57 = vand.u32 31, %v1276_v47 }
 0x142   :  { %v1073_v53 = vsub.s32 32, %v1072_v46  ;;  %v1075_v55 = vshll.u32 %v1730_v54, %v1072_v46  ;;  %v1078_v59 = vshll.u32 %v1731_v58, %v1072_v46  ;;  %v1081_v61 = vshll.u32 %v1732_v60, %v1072_v46 }
 0x143   :  { %v1084_v63 = vshll.u32 %v1733_v62, %v1072_v46  ;;  %v1087_v2 = vshll.u32 %v1734_v1, %v1072_v46  ;;  %vm1090_vm3 = vcmp.lt.s32.totalorder %v1071_v45, 1  ;;  %vm1091_vm4 = vcmp.lt.s32.totalorder %v1071_v45, 2 }
 0x144   :  { %v1076_v3 = vshrl.u32 %v1731_v58, %v1073_v53  ;;  %v1079_v4 = vshrl.u32 %v1732_v60, %v1073_v53  ;;  %v1082_v5 = vshrl.u32 %v1733_v62, %v1073_v53  ;;  %v1074_v6 = vshrl.u32 %v1730_v54, %v1073_v53 }
 0x145   :  { %v1085_v7 = vshrl.u32 %v1734_v1, %v1073_v53  ;;  %v1088_v11 = vshrl.u32 %v1735_v8, %v1073_v53  ;;  %v1279_v15 = vsub.s32 32, %v1278_v57  ;;  %vm1092_vm5 = vcmp.lt.s32.totalorder %v1071_v45, 3 }
 0x146   :  { %v1077_v12 = vor.u32 %v1076_v3, %v1075_v55  ;;  %v1080_v13 = vor.u32 %v1079_v4, %v1078_v59  ;;  %v1083_v14 = vor.u32 %v1082_v5, %v1081_v61  ;;  %vm1093_vm6 = vcmp.lt.s32.totalorder %v1071_v45, 4 }
 0x147   :  { %v1086_v0 = vor.u32 %v1085_v7, %v1084_v63  ;;  %v1089_v16 = vor.u32 %v1088_v11, %v1087_v2  ;;  %v1281_v29 = vshll.u32 %v1730_v54, %v1278_v57  ;;  %v1282_v32 = vshrl.u32 %v1731_v58, %v1279_v15 }
 0x148   :  { %v1094_v17 = vsel %vm1090_vm3, %v1074_v6, %v1077_v12  ;;  %v1095_v18 = vsel %vm1093_vm6, %v1083_v14, 2102212464  ;;  %v1098_v21 = vsel %vm1090_vm3, %v1077_v12, %v1080_v13  ;;  %v1102_v22 = vsel %vm1090_vm3, %v1080_v13, %v1083_v14 }
 0x149   :  { %v1096_v25 = vsel %vm1092_vm5, %v1080_v13, %v1095_v18  ;;  %v1099_v27 = vsel %vm1093_vm6, %v1086_v0, 920167782  ;;  %v1103_v28 = vsel %vm1093_vm6, %v1089_v16, 1326507024  ;;  %v1284_v33 = vshll.u32 %v1731_v58, %v1278_v57 }
 0x14a   :  { %v1100_v30 = vsel %vm1092_vm5, %v1083_v14, %v1099_v27  ;;  %v1104_v31 = vsel %vm1092_vm5, %v1086_v0, %v1103_v28  ;;  %v1097_v34 = vsel %vm1091_vm4, %v1094_v17, %v1096_v25  ;;  %v1285_v37 = vshrl.u32 %v1732_v60, %v1279_v15 }
 0x14b   :  { %v1101_v35 = vsel %vm1091_vm4, %v1098_v21, %v1100_v30  ;;  %v1105_v36 = vsel %vm1091_vm4, %v1102_v22, %v1104_v31  ;;  %v1283_v43 = vor.u32 %v1282_v32, %v1281_v29  ;;  %v1287_v46 = vshll.u32 %v1732_v60, %v1278_v57 }
 0x14c   :  { %v1933_v38 = vmul.u32.u64.low %v1898_v49, %v1105_v36  ;;  %v1934_v39 = vmul.u32.u64.high %v1898_v49, %v1105_v36, %v1933_v38  ;;  %v1937_v40 = vmul.u32.u64.low %v1898_v49, %v1101_v35  ;;  %v1938_v41 = vmul.u32.u64.high %v1898_v49, %v1101_v35, %v1937_v40 }
 0x14d   :  { %v1286_v44 = vor.u32 %v1285_v37, %v1284_v33  ;;  %v1288_v47 = vshrl.u32 %v1733_v62, %v1279_v15  ;;  %v1280_v53 = vshrl.u32 %v1730_v54, %v1279_v15  ;;  %v1290_v45 = vshll.u32 %v1733_v62, %v1278_v57 }
 0x14e   :  { %v1291_v55 = vshrl.u32 %v1734_v1, %v1279_v15  ;;  %v1294_v59 = vshrl.u32 %v1735_v8, %v1279_v15  ;;  %v1113_v61 = vmul.u32 %v1898_v49, %v1097_v34  ;;  %v1293_v2 = vshll.u32 %v1734_v1, %v1278_v57 }
 0x14f   :  { %v1289_v63 = vor.u32 %v1288_v47, %v1287_v46  ;;  %vm1296_vm8 = vcmp.lt.s32.totalorder %v1909_v56, 1  ;;  %vm1115_vm9 = vc.u32 %v1934_v39, %v1937_v40  ;;  %v1116_v3 = vadd.s32 1, %v1938_v41 }
 0x150   :  { %v1292_v4 = vor.u32 %v1291_v55, %v1290_v45  ;;  %vm1297_vm10 = vcmp.lt.s32.totalorder %v1909_v56, 2  ;;  %v1295_v5 = vor.u32 %v1294_v59, %v1293_v2  ;;  %vm1298_vm11 = vcmp.lt.s32.totalorder %v1909_v56, 3 }
 0x151   :  { %vm1299_vm12 = vcmp.lt.s32.totalorder %v1909_v56, 4  ;;  %v1304_v6 = vsel %vm1296_vm8, %v1283_v43, %v1286_v44  ;;  %v1117_v49 = vsel %vm1115_vm9, %v1116_v3, %v1938_v41  ;;  %v1308_v57 = vsel %vm1296_vm8, %v1286_v44, %v1289_v63 }
 0x152   :  { %v1301_v7 = vsel %vm1299_vm12, %v1289_v63, 2102212464  ;;  %v1305_v11 = vsel %vm1299_vm12, %v1292_v4, 920167782  ;;  %v1118_v12 = vadd.s32 %v1117_v49, %v1113_v61  ;;  %v1300_v13 = vsel %vm1296_vm8, %v1280_v53, %v1283_v43 }
 0x153   :  { %v1306_v14 = vsel %vm1298_vm11, %v1289_v63, %v1305_v11  ;;  %v1309_v15 = vsel %vm1299_vm12, %v1295_v5, 1326507024  ;;  %v1302_v0 = vsel %vm1298_vm11, %v1286_v44, %v1301_v7  ;;  %v1173_v18 = vsel %vm1172_vm7, %v1906_v52, 0 }
 0x154   :  { %v1307_v16 = vsel %vm1297_vm10, %v1304_v6, %v1306_v14  ;;  %v1310_v17 = vsel %vm1298_vm11, %v1292_v4, %v1309_v15  ;;  %v1119_v21 = vadd.s32 536870912, %v1118_v12  ;;  %v1169_v30 = vor.u32 8388608, %v1904_v51 }
 0x155   :  { %v1311_v22 = vsel %vm1297_vm10, %v1308_v57, %v1310_v17  ;;  %v1963_v25 = vmul.u32.u64.low %v1900_v50, %v1307_v16  ;;  %v1964_v27 = vmul.u32.u64.high %v1900_v50, %v1307_v16, %v1963_v25  ;;  %v1370_v31 = vand.u32 2139095040, %v1896_v48 }
 0x156   :  { %v1968_v28 = vmul.u32.u64.low %v1900_v50, %v1311_v22  ;;  %v1969_v29 = vmul.u32.u64.high %v1900_v50, %v1311_v22, %v1968_v28  ;;  %v1973_v32 = vshrl.u32 %v1119_v21, 30  ;;  %v1303_v52 = vsel %vm1297_vm10, %v1300_v13, %v1302_v0 }
 0x157   :  { %v1175_v33 = vand.u32 31, %v1173_v18  ;;  %v1322_v35 = vadd.s32 1, %v1964_v27  ;;  %v1319_v37 = vmul.u32 %v1900_v50, %v1303_v52  ;;  %v1982_v38 = vshll.u32 %v1169_v30, 8 }
 0x158   :  { %v1121_v34 = vshll.u32 %v1973_v32, 30  ;;  %vm1321_vm13 = vc.u32 %v1969_v29, %v1963_v25  ;;  %v1371_v51 = vshrl.u32 %v1370_v31, 23  ;;  %v1174_v56 = vshrl.u32 %v1173_v18, 5 }
 0x159   :  { %v1176_v36 = vsub.s32 32, %v1175_v33  ;;  %v1323_v43 = vsel %vm1321_vm13, %v1322_v35, %v1964_v27  ;;  %v1178_v44 = vshll.u32 %v1730_v54, %v1175_v33  ;;  %v1181_v53 = vshll.u32 %v1731_v58, %v1175_v33 }
 0x15a   :  { %v1984_v41 = vsub.s32 %v1118_v12, %v1121_v34  ;;  %v1324_v46 = vadd.s32 %v1323_v43, %v1319_v37  ;;  %v1114_v45 = vadd.s32 %v1937_v40, %v1934_v39  ;;  %v1184_v59 = vshll.u32 %v1732_v60, %v1175_v33 }
 0x15b   :  { %v1179_v47 = vshrl.u32 %v1731_v58, %v1176_v36  ;;  %v1182_v50 = vshrl.u32 %v1732_v60, %v1176_v36  ;;  %v1185_v61 = vshrl.u32 %v1733_v62, %v1176_v36  ;;  %v1532_v4 = vadd.s32 4294967169, %v1371_v51 }
 0x15c   :  { %v1124_v55 = vsub.s32 0, %v1984_v41  ;;  %v1325_v63 = vadd.s32 536870912, %v1324_v46  ;;  %v1187_v49 = vshll.u32 %v1733_v62, %v1175_v33  ;;  %v1188_v7 = vshrl.u32 %v1734_v1, %v1176_v36 }
 0x15d   :  { %v1180_v2 = vor.u32 %v1179_v47, %v1178_v44  ;;  %v1183_v3 = vor.u32 %v1182_v50, %v1181_v53  ;;  %v1186_v6 = vor.u32 %v1185_v61, %v1184_v59  ;;  %v1190_v39 = vshll.u32 %v1734_v1, %v1175_v33 }
 0x15e   :  { %v1521_v5 = vmin.u32 %v1124_v55, %v1984_v41  ;;  %v1998_v11 = vshrl.u32 %v1325_v63, 30  ;;  %v1191_v40 = vshrl.u32 %v1735_v8, %v1176_v36  ;;  %vm1193_vm14 = vcmp.lt.s32.totalorder %v1174_v56, 1 }
 0x15f   :  { %v1189_v12 = vor.u32 %v1188_v7, %v1187_v49  ;;  %vm1195_vm15 = vcmp.lt.s32.totalorder %v1174_v56, 3  ;;  %vm1196_vm0 = vcmp.lt.s32.totalorder %v1174_v56, 4  ;;  %v1177_v14 = vshrl.u32 %v1730_v54, %v1176_v36 }
 0x160   :  { %v1126_v57 = vclz %v1521_v5  ;;  %v1327_v13 = vshll.u32 %v1998_v11, 30  ;;  %v1192_v15 = vor.u32 %v1191_v40, %v1190_v39  ;;  %v1201_v0 = vsel %vm1193_vm14, %v1180_v2, %v1183_v3 }
 0x161   :  { %v1198_v17 = vsel %vm1196_vm0, %v1186_v6, 2102212464  ;;  %v1202_v18 = vsel %vm1196_vm0, %v1189_v12, 920167782  ;;  %v1205_v21 = vsel %vm1193_vm14, %v1183_v3, %v1186_v6  ;;  %v1377_v30 = vadd.s32 1, %v1532_v4 }
 0x162   :  { %v1522_v16 = vadd.s32 4294967294, %v1126_v57  ;;  %v2006_v22 = vsub.s32 %v1324_v46, %v1327_v13  ;;  %v1203_v27 = vsel %vm1195_vm15, %v1186_v6, %v1202_v18  ;;  %v1206_v28 = vsel %vm1196_vm0, %v1192_v15, 1326507024 }
 0x163   :  { %vm1194_vm2 = vcmp.lt.s32.totalorder %v1174_v56, 2  ;;  %v1197_v31 = vsel %vm1193_vm14, %v1177_v14, %v1180_v2  ;;  %v1207_v52 = vsel %vm1195_vm15, %v1189_v12, %v1206_v28  ;;  %v1199_v44 = vsel %vm1195_vm15, %v1183_v3, %v1198_v17 }
 0x164   :  { %vm1523_vm1 = vcmp.lt.s32.totalorder %v1522_v16, 0  ;;  %v1330_v34 = vsub.s32 0, %v2006_v22  ;;  %v1204_v35 = vsel %vm1194_vm2, %v1201_v0, %v1203_v27  ;;  %v1208_v36 = vsel %vm1194_vm2, %v1205_v21, %v1207_v52 }
 0x165   :  { %v1129_v33 = vsel %vm1523_vm1, 0, %v1522_v16  ;;  %v2018_v47 = vmul.u32.u64.low %v1982_v38, %v1208_v36  ;;  %v2019_v53 = vmul.u32.u64.high %v1982_v38, %v1208_v36, %v2018_v47  ;;  %vm1378_vm3 = vcmp.gt.s32.totalorder %v1377_v30, 0 }
 0x166   :  { %v1130_v37 = vsub.s32 32, %v1129_v33  ;;  %v1131_v51 = vshll.u32 %v1984_v41, %v1129_v33  ;;  %v1134_v43 = vsub.s32 4294967266, %v1129_v33  ;;  %v1529_v46 = vmin.u32 %v1330_v34, %v2006_v22 }
 0x167   :  { %v2022_v59 = vmul.u32.u64.low %v1982_v38, %v1204_v35  ;;  %v2023_v61 = vmul.u32.u64.high %v1982_v38, %v1204_v35, %v2022_v59  ;;  %v1144_v63 = vsub.s32 4, %v1973_v32  ;;  %v1200_v41 = vsel %vm1194_vm2, %v1197_v31, %v1199_v44 }
 0x168   :  { %v1132_v50 = vshrl.u32 %v1114_v45, %v1130_v37  ;;  %v1135_v55 = vadd.s32 127, %v1134_v43  ;;  %v1379_v2 = vsel %vm1378_vm3, %v1377_v30, 0  ;;  %v1332_v5 = vclz %v1529_v46 }
 0x169   :  { %v1381_v6 = vand.u32 31, %v1379_v2  ;;  %vm1218_vm4 = vc.u32 %v2019_v53, %v2022_v59  ;;  %vm1060_vm5 = vcmp.lt.s32.totalorder %v1879_v19, 0  ;;  %v1219_v49 = vadd.s32 1, %v2023_v61 }
 0x16a   :  { %v1133_v3 = vor.u32 %v1132_v50, %v1131_v51  ;;  %v1136_v4 = vshll.u32 %v1135_v55, 23  ;;  %v1145_v7 = vsel %vm1060_vm5, %v1144_v63, %v1973_v32  ;;  %v1216_v56 = vmul.u32 %v1982_v38, %v1200_v41 }
 0x16b   :  { %v1367_v39 = vand.u32 2147483647, %v1896_v48  ;;  %v1382_v40 = vsub.s32 32, %v1381_v6  ;;  %v1530_v13 = vadd.s32 4294967294, %v1332_v5  ;;  %v1220_v14 = vsel %vm1218_vm4, %v1219_v49, %v2023_v61 }
 0x16c   :  { %v1137_v45 = vor.u32 4788187, %v1136_v4  ;;  %v1140_v12 = vcvt.s32.f32 %v1133_v3  ;;  %v1221_v15 = vadd.s32 %v1220_v14, %v1216_v56  ;;  %vm2040_vm6 = vcmp.le.f32.partialorder %v1058_v24, 0.7853982 }
 0x16d   :  { %v1147_v32 = vsel %vm2040_vm6, 0, %v1145_v7  ;;  %v1374_v17 = vand.u32 8388607, %v1367_v39  ;;  %v1385_v18 = vshrl.u32 %v1731_v58, %v1382_v40  ;;  %vm1531_vm7 = vcmp.lt.s32.totalorder %v1530_v13, 0 }
 0x16e   :  { %v1138_v57 = vand.u32 2147483647, %v1137_v45  ;;  %v1222_v38 = vadd.s32 536870912, %v1221_v15  ;;  %v1380_v27 = vshrl.u32 %v1379_v2, 5  ;;  %v1388_v28 = vshrl.u32 %v1732_v60, %v1382_v40 }
 0x16f   :  { %v1384_v24 = vshll.u32 %v1730_v54, %v1381_v6  ;;  %v1391_v31 = vshrl.u32 %v1733_v62, %v1382_v40  ;;  %v1394_v52 = vshrl.u32 %v1734_v1, %v1382_v40  ;;  %v1387_v34 = vshll.u32 %v1731_v58, %v1381_v6 }
 0x170   :  { %v1141_v16 = vmul.f32 %v1140_v12, %v1138_v57  ;;  %v2050_v30 = vshrl.u32 %v1222_v38, 30  ;;  %v1393_v35 = vshll.u32 %v1733_v62, %v1381_v6  ;;  %v1397_v36 = vshrl.u32 %v1735_v8, %v1382_v40 }
 0x171   :  { %v1386_v43 = vor.u32 %v1385_v18, %v1384_v24  ;;  %v1390_v44 = vshll.u32 %v1732_v60, %v1381_v6  ;;  %v1389_v46 = vor.u32 %v1388_v28, %v1387_v34  ;;  %v1396_v50 = vshll.u32 %v1734_v1, %v1381_v6 }
 0x172   :  { %v1142_v21 = vxor.u32 2147483648, %v1141_v16  ;;  %v1224_v51 = vshll.u32 %v2050_v30, 30  ;;  %v1395_v47 = vor.u32 %v1394_v52, %v1393_v35  ;;  %v1151_v55 = vand.u32 3, %v1147_v32 }
 0x173   :  { %v1392_v62 = vor.u32 %v1391_v31, %v1390_v44  ;;  %v1375_v8 = vor.u32 8388608, %v1374_v17  ;;  %v1398_v61 = vor.u32 %v1397_v36, %v1396_v50  ;;  %v2069_v63 = vsel %vm1531_vm7, 0, %v1530_v13 }
 0x174   :  { %v1143_v33 = vsel %vm1060_vm5, %v1142_v21, %v1141_v16  ;;  %v2066_v58 = vsub.s32 %v1221_v15, %v1224_v51  ;;  %vm1399_vm8 = vcmp.lt.s32.totalorder %v1380_v27, 1  ;;  %vm1402_vm9 = vcmp.lt.s32.totalorder %v1380_v27, 4 }
 0x175   :  { %v1146_v37 = vsel %vm2040_vm6, %v1879_v19, %v1143_v33  ;;  %v1383_v60 = vshrl.u32 %v1730_v54, %v1382_v40  ;;  %vm1401_vm10 = vcmp.lt.s32.totalorder %v1380_v27, 3  ;;  %v1407_v2 = vsel %vm1399_vm8, %v1386_v43, %v1389_v46 }
 0x176   :  { %1637 = vcosq.f32 %v1146_v37  ;;  %v1227_v41 = vsub.s32 0, %v2066_v58  ;;  %v1408_v1 = vsel %vm1402_vm9, %v1395_v47, 920167782  ;;  %vm1400_vm11 = vcmp.lt.s32.totalorder %v1380_v27, 2 }
 0x177   :  { %1639 = vsinq.f32 %v1146_v37  ;;  %v1404_v4 = vsel %vm1402_vm9, %v1392_v62, 2102212464  ;;  %v1409_v5 = vsel %vm1401_vm10, %v1392_v62, %v1408_v1  ;;  %v1411_v45 = vsel %vm1399_vm8, %v1389_v46, %v1392_v62 }
 0x178   :  { %v1525_v3 = vmin.u32 %v1227_v41, %v2066_v58  ;;  %v1410_v6 = vsel %vm1400_vm11, %v1407_v2, %v1409_v5  ;;  %v1412_v49 = vsel %vm1402_vm9, %v1398_v61, 1326507024  ;;  %v1415_v7 = vshll.u32 %v1375_v8, 8 }
 0x179   :  { %v1340_v56 = vsub.s32 4294967266, %v2069_v63  ;;  %v1403_v54 = vsel %vm1399_vm8, %v1383_v60, %v1386_v43  ;;  %v1413_v40 = vsel %vm1401_vm10, %v1395_v47, %v1412_v49  ;;  %v1405_v12 = vsel %vm1401_vm10, %v1389_v46, %v1404_v4 }
 0x17a   :  { %v1229_v57 = vclz %v1525_v3  ;;  %v1414_v13 = vsel %vm1400_vm11, %v1411_v45, %v1413_v40  ;;  %v2080_v14 = vmul.u32.u64.low %v1415_v7, %v1410_v6  ;;  %v2081_v15 = vmul.u32.u64.high %v1415_v7, %v1410_v6, %v2080_v14 }
 0x17b   :  { %v2084_v16 = vmul.u32.u64.low %v1415_v7, %v1414_v13  ;;  %v2085_v32 = vmul.u32.u64.high %v1415_v7, %v1414_v13, %v2084_v16  ;;  %vm1150_vm12 = vweird.f32 %v1879_v19  ;;  %v1320_v17 = vadd.s32 %v1963_v25, %v1969_v29 }
 0x17c   :  { %v1526_v0 = vadd.s32 4294967294, %v1229_v57  ;;  %v1217_v18 = vadd.s32 %v2022_v59, %v2019_v53  ;;  %vm1152_vm13 = vcmp.lt.s32.totalorder %v1151_v55, 2  ;;  %v1336_v28 = vsub.s32 32, %v2069_v63 }
 0x17d   :  { %v1406_v24 = vsel %vm1400_vm11, %v1403_v54, %v1405_v12  ;;  %v1341_v52 = vadd.s32 127, %v1340_v56  ;;  %v1425_v34 = vadd.s32 1, %v2081_v15  ;;  %vm1153_vm15 = vcmp.eq.s32.totalorder %v1151_v55, 0 }
 0x17e   :  { %vm1527_vm14 = vcmp.lt.s32.totalorder %v1526_v0, 0  ;;  %vm1156_vm0 = vcmp.eq.s32.totalorder %v1151_v55, 2  ;;  %v1422_v25 = vmul.u32 %v1415_v7, %v1406_v24  ;;  %vm1424_vm1 = vc.u32 %v2085_v32, %v2080_v14 }
 0x17f   :  { %v1232_v33 = vsel %vm1527_vm14, 0, %v1526_v0  ;;  %v1426_v27 = vsel %vm1424_vm1, %v1425_v34, %v2081_v15  ;;  %v1342_v44 = vshll.u32 %v1341_v52, 23  ;;  %v1338_v8 = vshrl.u32 %v1320_v17, %v1336_v28 }
 0x180   :  { %v1638_v38 = vpop.eup %1637  ;;  %v1233_v36 = vsub.s32 32, %v1232_v33  ;;  %v1237_v37 = vsub.s32 4294967266, %v1232_v33  ;;  %v1234_v46 = vshll.u32 %v2066_v58, %v1232_v33  ;;  %v1427_v47 = vadd.s32 %v1426_v27, %v1422_v25 }
 0x181   :  { %v1640_v21 = vpop.eup %1639  ;;  %v1157_v31 = vxor.u32 2147483648, %v1638_v38  ;;  %v1337_v2 = vshll.u32 %v2006_v22, %v2069_v63  ;;  %v1343_v1 = vor.u32 4788187, %v1342_v44  ;;  %vm1163_vm2 = vcmp.lt.s32.totalorder %v1883_v23, 0 }
 0x182   :  { %v1154_v35 = vxor.u32 2147483648, %v1640_v21  ;;  %v1235_v59 = vshrl.u32 %v1217_v18, %v1233_v36  ;;  %v1238_v51 = vadd.s32 127, %v1237_v37  ;;  %v1428_v41 = vadd.s32 536870912, %v1427_v47 }
 0x183   :  { %v1158_v53 = vsel %vm1156_vm0, %v1157_v31, %v1640_v21  ;;  %v1339_v4 = vor.u32 %v1338_v8, %v1337_v2  ;;  %v1344_v6 = vand.u32 2147483647, %v1343_v1  ;;  %vm2114_vm3 = vcmp.le.f32.partialorder %v1161_v42, 0.7853982 }
 0x184   :  { %v1155_v29 = vsel %vm1153_vm15, %v1638_v38, %v1154_v35  ;;  %v1239_v62 = vshll.u32 %v1238_v51, 23  ;;  %v1236_v61 = vor.u32 %v1235_v59, %v1234_v46  ;;  %v2106_v3 = vshrl.u32 %v1428_v41, 30 }
 0x185   :  { %v1159_v43 = vsel %vm1152_vm13, %v1155_v29, %v1158_v53  ;;  %v1346_v49 = vcvt.s32.f32 %v1339_v4  ;;  %vm1266_vm5 = vcmp.lt.s32.totalorder %v1881_v20, 0  ;;  %v1423_v38 = vadd.s32 %v2080_v14, %v2085_v32 }
 0x186   :  { %v2102_v50 = vsel %vm1150_vm12, nan, %v1159_v43  ;;  %v1240_v60 = vor.u32 4788187, %v1239_v62  ;;  %v1243_v5 = vcvt.s32.f32 %v1236_v61  ;;  %v1430_v58 = vshll.u32 %v2106_v3, 30 }
 0x187   :  { %v1347_v56 = vmul.f32 %v1346_v49, %v1344_v6  ;;  %vm2128_vm6 = vcmp.le.f32.partialorder %v1264_v26, 0.7853982  ;;  %v1247_v14 = vsub.s32 4, %v2050_v30  ;;  %v1350_v35 = vsub.s32 4, %v1998_v11 }
 0x188   :  { %v1241_v55 = vand.u32 2147483647, %v1240_v60  ;;  %v1431_v45 = vsub.s32 %v1427_v47, %v1430_v58  ;;  %vm1369_vm7 = vcmp.lt.s32.totalorder %v1896_v48, 0  ;;  %vm2148_vm8 = vcmp.le.f32.partialorder %v1367_v39, 0.7853982 }
 0x189   :  { %v1348_v22 = vxor.u32 2147483648, %v1347_v56  ;;  %v1248_v36 = vsel %vm1163_vm2, %v1247_v14, %v2050_v30  ;;  %v1351_v51 = vsel %vm1266_vm5, %v1350_v35, %v1998_v11  ;;  %v1453_v43 = vsub.s32 4, %v2106_v3 }
 0x18a   :  { %v1244_v19 = vmul.f32 %v1243_v5, %v1241_v55  ;;  %v1433_v7 = vsub.s32 0, %v1431_v45  ;;  %v1250_v29 = vsel %vm2114_vm3, 0, %v1248_v36  ;;  %v1353_v11 = vsel %vm2128_vm6, 0, %v1351_v51 }
 0x18b   :  { %v1349_v16 = vsel %vm1266_vm5, %v1348_v22, %v1347_v56  ;;  %v1254_v44 = vand.u32 3, %v1250_v29  ;;  %v1454_v39 = vsel %vm1369_vm7, %v1453_v43, %v2106_v3  ;;  %v1357_v41 = vand.u32 3, %v1353_v11 }
 0x18c   :  { %v1245_v57 = vxor.u32 2147483648, %v1244_v19  ;;  %v1533_v54 = vmin.u32 %v1433_v7, %v1431_v45  ;;  %v1352_v31 = vsel %vm2128_vm6, %v1881_v20, %v1349_v16  ;;  %v1456_v4 = vsel %vm2148_vm8, 0, %v1454_v39 }
 0x18d   :  { %vm1256_vm9 = vcmp.eq.s32.totalorder %v1254_v44, 0  ;;  %vm1259_vm10 = vcmp.eq.s32.totalorder %v1254_v44, 2  ;;  %v1736_v5 = vmov 1966171168   ;;  %vm1255_vm11 = vcmp.lt.s32.totalorder %v1254_v44, 2 }
 0x18e   :  { %v1435_v40 = vclz %v1533_v54  ;;  %v1246_v63 = vsel %vm1163_vm2, %v1245_v57, %v1244_v19  ;;  %v1477_v58 = vunpack.c.l.s4 %v1736_v5  ;;  %vm1359_vm12 = vcmp.eq.s32.totalorder %v1357_v41, 0 }
 0x18f   :  { %v1249_v15 = vsel %vm2114_vm3, %v1883_v23, %v1246_v63  ;;  %vm1362_vm13 = vcmp.eq.s32.totalorder %v1357_v41, 2  ;;  %v1460_v19 = vand.u32 3, %v1456_v4  ;;  %vm1253_vm14 = vweird.f32 %v1883_v23 }
 0x190   :  { %v1534_v12 = vadd.s32 4294967294, %v1435_v40  ;;  %1641 = vcosq.f32 %v1249_v15  ;;  %v1478_v3 = vunpack.c.0.s8 %v1477_v58  ;;  %vm1358_vm15 = vcmp.lt.s32.totalorder %v1357_v41, 2 }
 0x191   :  { %1643 = vsinq.f32 %v1249_v15  ;;  %vm1356_vm0 = vweird.f32 %v1881_v20  ;;  %vm1465_vm1 = vcmp.eq.s32.totalorder %v1460_v19, 2  ;;  %vm1462_vm2 = vcmp.eq.s32.totalorder %v1460_v19, 0 }
 0x192   :  { %vm1535_vm4 = vcmp.lt.s32.totalorder %v1534_v12, 0  ;;  %1645 = vcosq.f32 %v1352_v31  ;;  %v1481_v13 = vsub.s32 %v1478_v3, %v1871_v10  ;;  %vm1461_vm3 = vcmp.lt.s32.totalorder %v1460_v19, 2 }
 0x193   :  { %v1438_v0 = vsel %vm1535_vm4, 0, %v1534_v12  ;;  %1647 = vsinq.f32 %v1352_v31  ;;  %vm1459_vm4 = vweird.f32 %v1896_v48  ;;  %vm1501_vm5 = vcmp.lt.s32.totalorder %v52_v9, 512 }
 0x194   :  { %v1439_v17 = vsub.s32 32, %v1438_v0  ;;  %v1443_v18 = vsub.s32 4294967266, %v1438_v0  ;;  %v1440_v21 = vshll.u32 %v1431_v45, %v1438_v0 }
 0x196   :  { %v1441_v28 = vshrl.u32 %v1423_v38, %v1439_v17  ;;  %v1444_v24 = vadd.s32 127, %v1443_v18 }
 0x198   :  { %v1442_v52 = vor.u32 %v1441_v28, %v1440_v21  ;;  %v1445_v33 = vshll.u32 %v1444_v24, 23 }
 0x19a   :  { %v1446_v32 = vor.u32 4788187, %v1445_v33  ;;  %v1449_v34 = vcvt.s32.f32 %v1442_v52  ;;  %v1642_v25 = vpop.eup %1641 }
 0x19b   :  { %v1644_v59 = vpop.eup %1643  ;;  %v1260_v8 = vxor.u32 2147483648, %v1642_v25 }
 0x19c   :  { %v1447_v26 = vand.u32 2147483647, %v1446_v32  ;;  %v1646_v47 = vpop.eup %1645  ;;  %v1257_v62 = vxor.u32 2147483648, %v1644_v59 }
 0x19d   :  { %v1648_v61 = vpop.eup %1647  ;;  %v1261_v2 = vsel %vm1259_vm10, %v1260_v8, %v1644_v59  ;;  %v1363_v55 = vxor.u32 2147483648, %v1646_v47 }
 0x19e   :  { %v1450_v37 = vmul.f32 %v1449_v34, %v1447_v26  ;;  %v1258_v60 = vsel %vm1256_vm9, %v1642_v25, %v1257_v62  ;;  %v1360_v1 = vxor.u32 2147483648, %v1648_v61 }
 0x19f   :  { %v1262_v6 = vsel %vm1255_vm11, %v1258_v60, %v1261_v2  ;;  %v1364_v49 = vsel %vm1362_vm13, %v1363_v55, %v1648_v61 }
 0x1a0   :  { %v1451_v53 = vxor.u32 2147483648, %v1450_v37  ;;  %v1361_v45 = vsel %vm1359_vm12, %v1646_v47, %v1360_v1  ;;  %v1263_v56 = vsel %vm1253_vm14, nan, %v1262_v6 }
 0x1a1   :  { %v1365_v54 = vsel %vm1358_vm15, %v1361_v45, %v1364_v49  ;;  %v1474_v12 = vcombine.low %v2102_v50, %v1263_v56 }
 0x1a2   :  { %v1452_v30 = vsel %vm1369_vm7, %v1451_v53, %v1450_v37  ;;  %v1366_v15 = vsel %vm1356_vm0, nan, %v1365_v54 }
 0x1a3   :  { %v1455_v46 = vsel %vm2148_vm8, %v1896_v48, %v1452_v30  ;;  %v1482_v17 = vrot.slane %v1474_v12, %v1481_v13 }
 0x1a4   :  { %1649 = vcosq.f32 %v1455_v46 }
 0x1a5   :  { %1651 = vsinq.f32 %v1455_v46 }
 0x1ae   :  { %v1650_v7 = vpop.eup %1649 }
 0x1af   :  { %v1652_v57 = vpop.eup %1651  ;;  %v1466_v40 = vxor.u32 2147483648, %v1650_v7 }
 0x1b0   :  { %v1463_v22 = vxor.u32 2147483648, %v1652_v57 }
 0x1b1   :  { %v1467_v63 = vsel %vm1465_vm1, %v1466_v40, %v1652_v57 }
 0x1b2   :  { %v1464_v23 = vsel %vm1462_vm2, %v1650_v7, %v1463_v22 }
 0x1b3   :  { %v1468_v0 = vsel %vm1461_vm3, %v1464_v23, %v1467_v63 }
 0x1b4   :  { %v1469_v16 = vsel %vm1459_vm4, nan, %v1468_v0 }
 0x1b5   :  { %v1475_v38 = vcombine.low %v1366_v15, %v1469_v16 }
 0x1b7   :  { %v1489_v18 = vrot.slane %v1475_v38, %v1481_v13 }
 0x1b9   :  { %v1490_v20 = vcombine.low %v1482_v17, %v1489_v18 }
 0x1bb   :  { %v1497_v42 = vrot.slane %v1490_v20, %v1481_v13 }
 0x1bd   :  { %1503 = vst.msk [vmem:[#allocation7] sm:$0xf] %vm1501_vm5, %v1497_v42 }
 0x1be   :  { %1708 = shalt.err (!%p1705_p6)
}
 0x1bf   :  { %s1709_s16 = scalar_lea.hbm %s2182_s3, 64 }
 0x1c0   :  { %p1710_p7 = scmp.ne.s32.totalorder %s2182_s3, %s1709_s16  ;;  %p1713_p8 = scmp.lt.u32.totalorder %s1709_s16, %s2182_s3 }
 0x1c2   :  { %p1715_p9 = pnand %p1713_p8, %p1710_p7 }
 0x1c4   :  { %1718 = shalt.err (!%p1715_p9)
}
 0x1c5   :  { %1513 = dma.vmem_to_hbm [thread:$0]  %s1511_s12, 64, %s2182_s3, [#allocation4]  }
 0x1c6   :  { %1723 = dma.done.wait [#allocation4], 64  }
 0x1c7   :  { %1724 = vsyncadd [#allocation4], 4294967232 }
 0x1c8   :  { %1517 = vsyncpa [#allocation3], 1 }
 0x1c9   :  { %1518 = vsyncpa [#allocation6], 1 }
 0x1ca   :  { %1519 = vsyncpa [#allocation4], 1 }

</bundles_post_ra>
